<compile_context>
chip_gen: v7x
topology: tpu7x:2x2x1
jax: 0.10.0
libtpu: 0.0.40
codegen_flags: <defaults>
</compile_context>

<pallas_src>
import jax
import jax.numpy as jnp
import numpy as np
from jax.experimental import pallas as pl
from jax.experimental.pallas import tpu as pltpu

LRELU_SLOPE = 0.2
BN_EPS = 1e-5


# ------------------------------ fused kernel -------------------------------- #

def _leaky_relu(y):
    return jnp.where(y > 0, y, LRELU_SLOPE * y)


def _dnet_fused_kernel(x_ref, a1_ref, b1_ref, a2_ref, p_ref, gb_ref, a3_ref,
                       o_ref):
    # layer 1: Conv2d(C, C, 4, 2, 1) as matmul + bias + LeakyReLU(0.2)
    y1 = jnp.dot(x_ref[...], a1_ref[...], preferred_element_type=jnp.float32)
    y1 = _leaky_relu(y1 + b1_ref[...])

    # layer 2: Conv2d(C, 2C, 4, 2, 1, bias=False) as matmul
    y2 = jnp.dot(y1, a2_ref[...], preferred_element_type=jnp.float32)

    # BatchNorm2d(2C), training-mode batch stats (biased variance, eps=1e-5).
    # Columns of y2 are (h, w, c)-flat with c fastest; p_ref is a [D2, D2]
    # projector that averages columns of the same channel, so
    #   (row-mean of y2) @ P == per-channel mean, broadcast back to all columns.
    inv_n = 1.0 / y2.shape[0]
    mean = jnp.dot(jnp.sum(y2, axis=0, keepdims=True) * inv_n, p_ref[...],
                   preferred_element_type=jnp.float32)
    d = y2 - mean
    var = jnp.dot(jnp.sum(d * d, axis=0, keepdims=True) * inv_n, p_ref[...],
                  preferred_element_type=jnp.float32)
    gamma = gb_ref[0:1, :]
    beta = gb_ref[1:2, :]
    y2 = _leaky_relu(d * jax.lax.rsqrt(var + BN_EPS) * gamma + beta)

    # layer 3: Conv2d(2C, 1, 2, bias=False) as matmul (output columns padded to
    # a lane-dense 128) + sigmoid.  view(-1) happens in the wrapper.
    y3 = jnp.dot(y2, a3_ref[...], preferred_element_type=jnp.float32)
    o_ref[...] = jax.nn.sigmoid(y3)


# ------------------------------ pallas_call glue ---------------------------- #

def _full_spec(shape):
    # one block == the whole (tiny) array; block == full dims satisfies tiling
    return pl.BlockSpec(shape, lambda i: (0,) * len(shape))


def d_net_forward(x_nchw, prep):
    n = x_nchw.shape[0]
    # NCHW (PyTorch) -> per-image (h, w, c)-flat rows
    x = jnp.transpose(x_nchw, (0, 2, 3, 1)).astype(jnp.float32).reshape(n, -1)
    operands = (x, prep["A1"], prep["b1f"], prep["A2"], prep["P"],
                prep["gb"], prep["A3"])
    out_cols = prep["A3"].shape[1]
    out = pl.pallas_call(
        _dnet_fused_kernel,
        grid=(1,),
        in_specs=[_full_spec(tuple(o.shape)) for o in operands],
        out_specs=_full_spec((n, out_cols)),
        out_shape=jax.ShapeDtypeStruct((n, out_cols), jnp.float32),
        compiler_params=pltpu.CompilerParams(
            dimension_semantics=("arbitrary",)),
    )(*operands)
    # keep only the real output columns; Cout==1 so this matches x.view(-1)
    return out[:, :prep["n_final"]].reshape(-1)


# ------------------------- one-time parameter prep --------------------------- #

def _conv_as_matrix(w_oihw, hin, win, stride, pad):
    """Dense [Hin*Win*Cin, Ho*Wo*Cout] matrix of a PyTorch Conv2d (cross-corr),
    acting on a (h, w, c)-flattened per-image input and producing a
    (ho, wo, co)-flattened output.  Zero padding is folded in (missing rows)."""
    w = np.asarray(w_oihw, dtype=np.float32)
    cout, cin, kh, kw = w.shape
    ho = (hin + 2 * pad - kh) // stride + 1
    wo = (win + 2 * pad - kw) // stride + 1
    a = np.zeros((hin * win * cin, ho * wo * cout), np.float32)
    for oy in range(ho):
        for ox in range(wo):
            ocol = (oy * wo + ox) * cout
            for ky in range(kh):
                iy = oy * stride - pad + ky
                if iy < 0 or iy >= hin:
                    continue
                for kx in range(kw):
                    ix = ox * stride - pad + kx
                    if ix < 0 or ix >= win:
                        continue
                    irow = (iy * win + ix) * cin
                    a[irow:irow + cin, ocol:ocol + cout] += w[:, :, ky, kx].T
    return a, ho, wo


def prepare_params(params, channels, hin, win):
    """Hoisted (call-once) lowering of PyTorch-layout params to fused-kernel
    operands: conv-as-matrix weights, broadcast bias/affine, BN projector."""
    c = channels
    a1, h1, w1 = _conv_as_matrix(params["w1"], hin, win, 2, 1)
    a2, h2, w2 = _conv_as_matrix(params["w2"], h1, w1, 2, 1)
    a3, _, _ = _conv_as_matrix(params["w3"], h2, w2, 1, 0)

    # layer-1 bias broadcast over spatial positions ((h,w,c)-flat, c fastest)
    b1f = np.tile(np.asarray(params["b1"], np.float32).reshape(-1),
                  h1 * w1)[None, :]

    # BN affine params broadcast to the flat layer-2 layout, packed in one op
    gamma = np.tile(np.asarray(params["gamma2"], np.float32).reshape(-1),
                    h2 * w2)
    beta = np.tile(np.asarray(params["beta2"], np.float32).reshape(-1),
                   h2 * w2)
    gb = np.stack([gamma, beta], axis=0)

    # channel-group averaging projector for BN stats:
    #   P[i, j] = 1/(H2*W2) if (i % 2C) == (j % 2C) else 0
    d2 = a2.shape[1]
    ch = np.arange(d2) % (2 * c)
    p = (ch[:, None] == ch[None, :]).astype(np.float32) / float(h2 * w2)

    # pad layer-3 output columns up to a multiple of 128 (lane-dense store)
    d3 = a3.shape[1]
    ncols = max(128, -(-d3 // 128) * 128)
    a3p = np.zeros((a3.shape[0], ncols), np.float32)
    a3p[:, :d3] = a3

    return {
        "A1": jnp.asarray(a1),
        "b1f": jnp.asarray(b1f),
        "A2": jnp.asarray(a2),
        "P": jnp.asarray(p),
        "gb": jnp.asarray(gb),
        "A3": jnp.asarray(a3p),
        "n_final": int(d3),
    }


# ------------------------------- parameters ---------------------------------- #

def init_params(key, channels):
    c = channels
    k = jax.random.split(key, 4)
    return {
        # Conv2d(c, c, 4, 2, 1) with bias
        "w1": jax.random.normal(k[0], (c, c, 4, 4), jnp.float32) * 0.1,
        "b1": jax.random.normal(k[1], (c,), jnp.float32) * 0.1,
        # Conv2d(c, 2c, 4, 2, 1, bias=False)
        "w2": jax.random.normal(k[2], (2 * c, c, 4, 4), jnp.float32) * 0.1,
        # BatchNorm2d(2c) default affine init
        "gamma2": jnp.ones((2 * c,), jnp.float32),
        "beta2": jnp.zeros((2 * c,), jnp.float32),
        # Conv2d(2c, 1, 2, bias=False)
        "w3": jax.random.normal(k[3], (1, 2 * c, 2, 2), jnp.float32) * 0.1,
    }


# --------------------------- pure-JAX reference ------------------------------ #

def _ref_forward(x_nchw, params):
    x = jnp.transpose(x_nchw, (0, 2, 3, 1)).astype(jnp.float32)

    def conv(v, w, stride, pad):
        return jax.lax.conv_general_dilated(
            v, jnp.transpose(w, (2, 3, 1, 0)), (stride, stride),
            [(pad, pad), (pad, pad)],
            dimension_numbers=("NHWC", "HWIO", "NHWC"))

    y = conv(x, params["w1"], 2, 1) + params["b1"].reshape(1, 1, 1, -1)
    y = jnp.where(y > 0, y, LRELU_SLOPE * y)
    y = conv(y, params["w2"], 2, 1)
    mean = jnp.mean(y, axis=(0, 1, 2), keepdims=True)
    var = jnp.mean((y - mean) ** 2, axis=(0, 1, 2), keepdims=True)
    y = (y - mean) / jnp.sqrt(var + BN_EPS)
    y = y * params["gamma2"].reshape(1, 1, 1, -1) \
        + params["beta2"].reshape(1, 1, 1, -1)
    y = jnp.where(y > 0, y, LRELU_SLOPE * y)
    y = conv(y, params["w3"], 1, 0)
    return jax.nn.sigmoid(y.reshape(-1))  # Cout==1 -> same order as NCHW flatten


# ----------------------------------- main ------------------------------------ #

if __name__ == "__main__":
    key = jax.random.PRNGKey(0)
    kx, kp = jax.random.split(key)

    channels = 4
    x = jax.random.normal(kx, (2, channels, 16, 16), jnp.float32)  # NCHW input
    params = init_params(kp, channels)

    # one-time lowering of conv weights -> fused-kernel operands (hoisted out
    # of the per-call forward path)
    prep = prepare_params(params, channels, 16, 16)

    forward = jax.jit(lambda inp: d_net_forward(inp, prep))
    out = jax.block_until_ready(forward(x))

    # 16x16 -> 8x8 -> 4x4 -> 3x3 (k=2, no pad); flattened over batch: 2*1*3*3
    assert out.shape == (2 * 3 * 3,), out.shape
    assert bool(jnp.all((out >= 0.0) & (out <= 1.0)))

    ref = _ref_forward(x, params)
    assert bool(jnp.allclose(out, ref, rtol=1e-3, atol=1e-3)), \
        float(jnp.max(jnp.abs(out - ref)))

    print("KERNEL_OK")
</pallas_src>

<mosaic_0001>
module attributes {stable_mosaic.version = 11 : i64} {
  func.func @_dnet_fused_kernel(%arg0: i32, %arg1: memref<2x1024xf32, #tpu.memory_space<vmem>>, %arg2: memref<1024x256xf32, #tpu.memory_space<vmem>>, %arg3: memref<1x256xf32, #tpu.memory_space<vmem>>, %arg4: memref<256x128xf32, #tpu.memory_space<vmem>>, %arg5: memref<128x128xf32, #tpu.memory_space<vmem>>, %arg6: memref<2x128xf32, #tpu.memory_space<vmem>>, %arg7: memref<128x128xf32, #tpu.memory_space<vmem>>, %arg8: memref<2x128xf32, #tpu.memory_space<vmem>>) attributes {dimension_semantics = [#tpu.dimension_semantics<arbitrary>], iteration_bounds = array<i64: 1>, scalar_prefetch = 0 : i64, scratch_operands = 0 : i64, tpu.core_type = #tpu.core_type<tc>, window_params = [{pipeline_mode = #tpu.pipeline_mode<synchronous>, transform_indices = @transform_0, window_bounds = array<i64: 2, 1024>}, {pipeline_mode = #tpu.pipeline_mode<synchronous>, transform_indices = @transform_1, window_bounds = array<i64: 1024, 256>}, {pipeline_mode = #tpu.pipeline_mode<synchronous>, transform_indices = @transform_2, window_bounds = array<i64: 1, 256>}, {pipeline_mode = #tpu.pipeline_mode<synchronous>, transform_indices = @transform_3, window_bounds = array<i64: 256, 128>}, {pipeline_mode = #tpu.pipeline_mode<synchronous>, transform_indices = @transform_4, window_bounds = array<i64: 128, 128>}, {pipeline_mode = #tpu.pipeline_mode<synchronous>, transform_indices = @transform_5, window_bounds = array<i64: 2, 128>}, {pipeline_mode = #tpu.pipeline_mode<synchronous>, transform_indices = @transform_6, window_bounds = array<i64: 128, 128>}, {pipeline_mode = #tpu.pipeline_mode<synchronous>, transform_indices = @transform_7, window_bounds = array<i64: 2, 128>}]} {
    %c0 = arith.constant 0 : index
    %c0_0 = arith.constant 0 : index
    %0 = vector.load %arg1[%c0, %c0_0] : memref<2x1024xf32, #tpu.memory_space<vmem>>, vector<2x1024xf32>
    %c0_1 = arith.constant 0 : index
    %c0_2 = arith.constant 0 : index
    %1 = vector.load %arg2[%c0_1, %c0_2] : memref<1024x256xf32, #tpu.memory_space<vmem>>, vector<1024x256xf32>
    %cst = arith.constant dense<0.000000e+00> : vector<2x256xf32>
    %2 = tpu.matmul %0, %1, %cst {dimension_numbers = #tpu.dot_dimension_numbers<[1], [0], [0], [1], [0, 0, 1, 1], [], []>} : vector<2x1024xf32>, vector<1024x256xf32>, vector<2x256xf32> -> vector<2x256xf32>
    %c0_3 = arith.constant 0 : index
    %c0_4 = arith.constant 0 : index
    %3 = vector.load %arg3[%c0_3, %c0_4] : memref<1x256xf32, #tpu.memory_space<vmem>>, vector<1x256xf32>
    %4 = vector.broadcast %3 : vector<1x256xf32> to vector<2x256xf32>
    %5 = arith.addf %2, %4 : vector<2x256xf32>
    %cst_5 = arith.constant 0.000000e+00 : f32
    %6 = vector.broadcast %cst_5 : f32 to vector<2x256xf32>
    %7 = arith.cmpf ogt, %5, %6 : vector<2x256xf32>
    %cst_6 = arith.constant 2.000000e-01 : f32
    %8 = vector.broadcast %cst_6 : f32 to vector<2x256xf32>
    %9 = arith.mulf %8, %5 : vector<2x256xf32>
    %10 = arith.select %7, %5, %9 : vector<2x256xi1>, vector<2x256xf32>
    %c0_7 = arith.constant 0 : index
    %c0_8 = arith.constant 0 : index
    %11 = vector.load %arg4[%c0_7, %c0_8] : memref<256x128xf32, #tpu.memory_space<vmem>>, vector<256x128xf32>
    %cst_9 = arith.constant dense<0.000000e+00> : vector<2x128xf32>
    %12 = tpu.matmul %10, %11, %cst_9 {dimension_numbers = #tpu.dot_dimension_numbers<[1], [0], [0], [1], [0, 0, 1, 1], [], []>} : vector<2x256xf32>, vector<256x128xf32>, vector<2x128xf32> -> vector<2x128xf32>
    %cst_10 = arith.constant dense<0.000000e+00> : vector<128xf32>
    %13 = vector.multi_reduction <add>, %12, %cst_10 [0] : vector<2x128xf32> to vector<128xf32>
    %14 = vector.shape_cast %13 : vector<128xf32> to vector<1x128xf32>
    %cst_11 = arith.constant 5.000000e-01 : f32
    %15 = vector.broadcast %cst_11 : f32 to vector<1x128xf32>
    %16 = arith.mulf %14, %15 : vector<1x128xf32>
    %c0_12 = arith.constant 0 : index
    %c0_13 = arith.constant 0 : index
    %17 = vector.load %arg5[%c0_12, %c0_13] : memref<128x128xf32, #tpu.memory_space<vmem>>, vector<128x128xf32>
    %cst_14 = arith.constant dense<0.000000e+00> : vector<1x128xf32>
    %18 = tpu.matmul %16, %17, %cst_14 {dimension_numbers = #tpu.dot_dimension_numbers<[1], [0], [0], [1], [0, 0, 1, 1], [], []>} : vector<1x128xf32>, vector<128x128xf32>, vector<1x128xf32> -> vector<1x128xf32>
    %19 = vector.broadcast %18 : vector<1x128xf32> to vector<2x128xf32>
    %20 = arith.subf %12, %19 : vector<2x128xf32>
    %21 = arith.mulf %20, %20 : vector<2x128xf32>
    %cst_15 = arith.constant dense<0.000000e+00> : vector<128xf32>
    %22 = vector.multi_reduction <add>, %21, %cst_15 [0] : vector<2x128xf32> to vector<128xf32>
    %23 = vector.shape_cast %22 : vector<128xf32> to vector<1x128xf32>
    %cst_16 = arith.constant 5.000000e-01 : f32
    %24 = vector.broadcast %cst_16 : f32 to vector<1x128xf32>
    %25 = arith.mulf %23, %24 : vector<1x128xf32>
    %c0_17 = arith.constant 0 : index
    %c0_18 = arith.constant 0 : index
    %26 = vector.load %arg5[%c0_17, %c0_18] : memref<128x128xf32, #tpu.memory_space<vmem>>, vector<128x128xf32>
    %cst_19 = arith.constant dense<0.000000e+00> : vector<1x128xf32>
    %27 = tpu.matmul %25, %26, %cst_19 {dimension_numbers = #tpu.dot_dimension_numbers<[1], [0], [0], [1], [0, 0, 1, 1], [], []>} : vector<1x128xf32>, vector<128x128xf32>, vector<1x128xf32> -> vector<1x128xf32>
    %c0_20 = arith.constant 0 : index
    %c0_21 = arith.constant 0 : index
    %28 = vector.load %arg6[%c0_20, %c0_21] : memref<2x128xf32, #tpu.memory_space<vmem>>, vector<1x128xf32>
    %c1 = arith.constant 1 : index
    %c0_22 = arith.constant 0 : index
    %29 = vector.load %arg6[%c1, %c0_22] : memref<2x128xf32, #tpu.memory_space<vmem>>, vector<1x128xf32>
    %cst_23 = arith.constant 9.99999974E-6 : f32
    %30 = vector.broadcast %cst_23 : f32 to vector<1x128xf32>
    %31 = arith.addf %27, %30 : vector<1x128xf32>
    %32 = math.rsqrt %31 : vector<1x128xf32>
    %33 = vector.broadcast %32 : vector<1x128xf32> to vector<2x128xf32>
    %34 = arith.mulf %20, %33 : vector<2x128xf32>
    %35 = vector.broadcast %28 : vector<1x128xf32> to vector<2x128xf32>
    %36 = arith.mulf %34, %35 : vector<2x128xf32>
    %37 = vector.broadcast %29 : vector<1x128xf32> to vector<2x128xf32>
    %38 = arith.addf %36, %37 : vector<2x128xf32>
    %cst_24 = arith.constant 0.000000e+00 : f32
    %39 = vector.broadcast %cst_24 : f32 to vector<2x128xf32>
    %40 = arith.cmpf ogt, %38, %39 : vector<2x128xf32>
    %cst_25 = arith.constant 2.000000e-01 : f32
    %41 = vector.broadcast %cst_25 : f32 to vector<2x128xf32>
    %42 = arith.mulf %41, %38 : vector<2x128xf32>
    %43 = arith.select %40, %38, %42 : vector<2x128xi1>, vector<2x128xf32>
    %c0_26 = arith.constant 0 : index
    %c0_27 = arith.constant 0 : index
    %44 = vector.load %arg7[%c0_26, %c0_27] : memref<128x128xf32, #tpu.memory_space<vmem>>, vector<128x128xf32>
    %cst_28 = arith.constant dense<0.000000e+00> : vector<2x128xf32>
    %45 = tpu.matmul %43, %44, %cst_28 {dimension_numbers = #tpu.dot_dimension_numbers<[1], [0], [0], [1], [0, 0, 1, 1], [], []>} : vector<2x128xf32>, vector<128x128xf32>, vector<2x128xf32> -> vector<2x128xf32>
    %46 = arith.negf %45 : vector<2x128xf32>
    %47 = math.exp %46 : vector<2x128xf32>
    %cst_29 = arith.constant 1.000000e+00 : f32
    %48 = vector.broadcast %cst_29 : f32 to vector<2x128xf32>
    %49 = arith.addf %48, %47 : vector<2x128xf32>
    %50 = arith.divf %48, %49 : vector<2x128xf32>
    %c0_30 = arith.constant 0 : index
    %c0_31 = arith.constant 0 : index
    %51 = vector.load %arg8[%c0_30, %c0_31] : memref<2x128xf32, #tpu.memory_space<vmem>>, vector<2x128xf32>
    tpu.vector_store %arg8[%c0_30, %c0_31], %50 {strides = array<i32>} : memref<2x128xf32, #tpu.memory_space<vmem>>, vector<2x128xf32>,
    return
  }
  func.func @transform_0(%arg0: i32) -> (i32, i32) {
    %c0_i32 = arith.constant 0 : i32
    %c0_i32_0 = arith.constant 0 : i32
    %c0_i32_1 = arith.constant 0 : i32
    return %c0_i32, %c0_i32_0 : i32, i32
  }
  func.func @transform_1(%arg0: i32) -> (i32, i32) {
    %c0_i32 = arith.constant 0 : i32
    %c0_i32_0 = arith.constant 0 : i32
    %c0_i32_1 = arith.constant 0 : i32
    return %c0_i32, %c0_i32_0 : i32, i32
  }
  func.func @transform_2(%arg0: i32) -> (i32, i32) {
    %c0_i32 = arith.constant 0 : i32
    %c0_i32_0 = arith.constant 0 : i32
    %c0_i32_1 = arith.constant 0 : i32
    return %c0_i32, %c0_i32_0 : i32, i32
  }
  func.func @transform_3(%arg0: i32) -> (i32, i32) {
    %c0_i32 = arith.constant 0 : i32
    %c0_i32_0 = arith.constant 0 : i32
    %c0_i32_1 = arith.constant 0 : i32
    return %c0_i32, %c0_i32_0 : i32, i32
  }
  func.func @transform_4(%arg0: i32) -> (i32, i32) {
    %c0_i32 = arith.constant 0 : i32
    %c0_i32_0 = arith.constant 0 : i32
    %c0_i32_1 = arith.constant 0 : i32
    return %c0_i32, %c0_i32_0 : i32, i32
  }
  func.func @transform_5(%arg0: i32) -> (i32, i32) {
    %c0_i32 = arith.constant 0 : i32
    %c0_i32_0 = arith.constant 0 : i32
    %c0_i32_1 = arith.constant 0 : i32
    return %c0_i32, %c0_i32_0 : i32, i32
  }
  func.func @transform_6(%arg0: i32) -> (i32, i32) {
    %c0_i32 = arith.constant 0 : i32
    %c0_i32_0 = arith.constant 0 : i32
    %c0_i32_1 = arith.constant 0 : i32
    return %c0_i32, %c0_i32_0 : i32, i32
  }
  func.func @transform_7(%arg0: i32) -> (i32, i32) {
    %c0_i32 = arith.constant 0 : i32
    %c0_i32_0 = arith.constant 0 : i32
    %c0_i32_1 = arith.constant 0 : i32
    return %c0_i32, %c0_i32_0 : i32, i32
  }
}

</mosaic_0001>

<bundles_post_ra>
// kernel: _lambda_.1
= control target key start
LH: loop header
LB: loop body
LE: loop exit
PB: predicated region body
PF: predicated region fallthrough
CT: control target
= control target key end

     0   :  { %12 = vsyncpa [#allocation3], 0  ;;  %s1645_s24 = smov [#allocation2]   ;;  %s1989_s0 = inlined_call_operand.vmem [shape: f32[2,1024], index: 0, kind: input, shape index: {}]   ;;  %s1990_s1 = inlined_call_operand.hbm [shape: f32[1024,256], index: 1, kind: input, shape index: {}]   ;;  %s1991_s2 = inlined_call_operand.vmem [shape: f32[1,256], index: 2, kind: input, shape index: {}]   ;;  %s1992_s3 = inlined_call_operand.vmem [shape: f32[256,128], index: 3, kind: input, shape index: {}]   ;;  %s1993_s4 = inlined_call_operand.vmem [shape: f32[128,128], index: 4, kind: input, shape index: {}]   ;;  %s1994_s5 = inlined_call_operand.vmem [shape: f32[2,128], index: 5, kind: input, shape index: {}]   ;;  %s1995_s6 = inlined_call_operand.vmem [shape: f32[128,128], index: 6, kind: input, shape index: {}]   ;;  %s1996_s7 = inlined_call_operand.vmem [shape: f32[2,128], index: 7, kind: output, shape index: {}]  }
   0x1   :  { %s20_s25 = sshll.u32 %s1645_s24, 4  ;;  %s1621_s28 = scalar_lea.hbm %s1990_s1, 32768  ;;  %s21_s25 = int_to_ptr.vmem [resolvable:$true] %s20_s25 }
   0x2   :  { %p1622_p0 = scmp.ne.s32.totalorder %s1990_s1, %s1621_s28  ;;  %p1625_p1 = scmp.lt.u32.totalorder %s1621_s28, %s1990_s1 }
   0x4   :  { %p1627_p2 = pnand %p1625_p1, %p1622_p0 }
   0x6   :  { %1630 = shalt.err (!%p1627_p2)
}
   0x7   :  { %s1631_s10 = scalar_lea.vmem %s21_s25, 32768  ;;  %p1636_p4 = scmp.lt.s32.totalorder %s21_s25, %s21_s25 }
   0x8   :  { %p1632_p3 = scmp.ne.s32.totalorder %s21_s25, %s1631_s10  ;;  %p1637_p5 = scmp.lt.s32.totalorder %s1631_s10, %s1631_s10 }
   0xa   :  { %p1638_p6 = por %p1637_p5, %p1636_p4 }
   0xc   :  { %p1639_p7 = pnand %p1638_p6, %p1632_p3 }
   0xe   :  { %1642 = shalt.err (!%p1639_p7)
}
   0xf   :  { %s1646_s11 = smov 256   ;;  %s1647_s12 = smov 16  }
  0x10   :  { %26 = dma.hbm_to_vmem [thread:$0]  %s1990_s1, 32768, %s21_s25, [#allocation3], %s1646_s11, %s1646_s11, %s1647_s12  }
  0x11   :  { %1643 = dma.done.wait [#allocation3], 32768  }
  0x12   :  { %1644 = vsyncadd [#allocation3], 4294934528  ;;  %v107_v0 = vld [vmem:[#allocation2 + $0x208] sm:$0xff]  ;;  %v109_v1 = vld [vmem:[#allocation2 + $0x218] sm:$0xff]  ;;  %v300_v26 = vlaneseq  ;;  %v1648_v27 = vmov 1983009808  }
  0x13   :  { %v106_v2 = vld [vmem:[#allocation2 + $0x200] sm:$0xff]  ;;  %v1302_v3 = vpack.c.bf16 %v109_v1, %v107_v0  ;;  %v108_v4 = vld [vmem:[#allocation2 + $0x210] sm:$0xff]  ;;  %v111_v5 = vld [vmem:[#allocation2 + $0x228] sm:$0xff]  ;;  %v314_v28 = vunpack.c.l.s4 %v1648_v27  ;;  %vm1650_vm2 = vmmov 0   ;;  %vm746_vm3 = vcmask 1041408  }
  0x14   :  { %v113_v6 = vld [vmem:[#allocation2 + $0x238] sm:$0xff]  ;;  %v1304_v7 = vpack.c.bf16 %v108_v4, %v106_v2  ;;  %v110_v9 = vld [vmem:[#allocation2 + $0x220] sm:$0xff]  ;;  %v112_v10 = vld [vmem:[#allocation2 + $0x230] sm:$0xff]  ;;  %v1704_v35 = vshrl.u32 %v300_v26, 7 }
  0x15   :  { %v1306_v8 = vpack.c.bf16 %v113_v6, %v111_v5  ;;  %v115_v11 = vld [vmem:[#allocation2 + $0x248] sm:$0xff]  ;;  %1303 = vmatprep.subr.bf16.mxu0 %v1302_v3  ;;  %v117_v12 = vld [vmem:[#allocation2 + $0x258] sm:$0xff]  ;;  %v1308_v13 = vpack.c.bf16 %v112_v10, %v110_v9  ;;  %v114_v15 = vld [vmem:[#allocation2 + $0x240] sm:$0xff]  ;;  %v315_v36 = vunpack.c.0.s8 %v314_v28 }
  0x16   :  { %1305 = vmatpush1.bf16.msra.mxu0 %v1304_v7  ;;  %v1310_v14 = vpack.c.bf16 %v117_v12, %v115_v11  ;;  %v116_v16 = vld [vmem:[#allocation2 + $0x250] sm:$0xff]  ;;  %v119_v17 = vld [vmem:[#allocation2 + $0x268] sm:$0xff]  ;;  %v121_v18 = vld [vmem:[#allocation2 + $0x278] sm:$0xff] }
  0x17   :  { %1307 = vmatprep.subr.bf16.mxu0 %v1306_v8  ;;  %v1312_v19 = vpack.c.bf16 %v116_v16, %v114_v15  ;;  %v1314_v20 = vpack.c.bf16 %v121_v18, %v119_v17  ;;  %v118_v21 = vld [vmem:[#allocation2 + $0x260] sm:$0xff]  ;;  %v120_v22 = vld [vmem:[#allocation2 + $0x270] sm:$0xff]  ;;  %v123_v23 = vld [vmem:[#allocation2 + $0x288] sm:$0xff]  ;;  %v1707_v43 = vsub.s32 %v315_v36, %v1704_v35 }
  0x18   :  { %v125_v24 = vld [vmem:[#allocation2 + $0x298] sm:$0xff]  ;;  %v1316_v25 = vpack.c.bf16 %v120_v22, %v118_v21  ;;  %v122_v30 = vld [vmem:[#allocation2 + $0x280] sm:$0xff]  ;;  %v124_v31 = vld [vmem:[#allocation2 + $0x290] sm:$0xff] }
  0x19   :  { %v1318_v29 = vpack.c.bf16 %v125_v24, %v123_v23  ;;  %v127_v32 = vld [vmem:[#allocation2 + $0x2a8] sm:$0xff]  ;;  %v129_v33 = vld [vmem:[#allocation2 + $0x2b8] sm:$0xff]  ;;  %v1320_v34 = vpack.c.bf16 %v124_v31, %v122_v30  ;;  %v126_v38 = vld [vmem:[#allocation2 + $0x2a0] sm:$0xff] }
  0x1a   :  { %1309 = vmatpush1.bf16.msra.mxu0 %v1308_v13  ;;  %v1322_v37 = vpack.c.bf16 %v129_v33, %v127_v32  ;;  %v128_v39 = vld [vmem:[#allocation2 + $0x2b0] sm:$0xff]  ;;  %v131_v40 = vld [vmem:[#allocation2 + $0x2c8] sm:$0xff]  ;;  %v133_v41 = vld [vmem:[#allocation2 + $0x2d8] sm:$0xff] }
  0x1b   :  { %1311 = vmatprep.subr.bf16.mxu0 %v1310_v14  ;;  %v1324_v42 = vpack.c.bf16 %v128_v39, %v126_v38  ;;  %v1326_v44 = vpack.c.bf16 %v133_v41, %v131_v40  ;;  %v130_v45 = vld [vmem:[#allocation2 + $0x2c0] sm:$0xff]  ;;  %v132_v46 = vld [vmem:[#allocation2 + $0x2d0] sm:$0xff]  ;;  %v135_v48 = vld [vmem:[#allocation2 + $0x2e8] sm:$0xff] }
  0x1c   :  { %v1712_v47 = vld [vmem:[%s1989_s0] sm:$0xff]  ;;  %v137_v49 = vld [vmem:[#allocation2 + $0x2f8] sm:$0xff]  ;;  %v1328_v51 = vpack.c.bf16 %v132_v46, %v130_v45  ;;  %v136_v55 = vld [vmem:[#allocation2 + $0x2f0] sm:$0xff] }
  0x1d   :  { %v312_v50 = vcombine.high %v1712_v47, %v1712_v47  ;;  %v1330_v53 = vpack.c.bf16 %v137_v49, %v135_v48  ;;  %v134_v54 = vld [vmem:[#allocation2 + $0x2e0] sm:$0xff]  ;;  %v139_v56 = vld [vmem:[#allocation2 + $0x308] sm:$0xff]  ;;  %v141_v57 = vld [vmem:[#allocation2 + $0x318] sm:$0xff] }
  0x1e   :  { %1313 = vmatpush1.bf16.msra.mxu0 %v1312_v19  ;;  %v1332_v59 = vpack.c.bf16 %v136_v55, %v134_v54  ;;  %v1334_v60 = vpack.c.bf16 %v141_v57, %v139_v56  ;;  %v138_v61 = vld [vmem:[#allocation2 + $0x300] sm:$0xff]  ;;  %v140_v62 = vld [vmem:[#allocation2 + $0x310] sm:$0xff]  ;;  %v143_v63 = vld [vmem:[#allocation2 + $0x328] sm:$0xff] }
  0x1f   :  { %1315 = vmatprep.subr.bf16.mxu0 %v1314_v20  ;;  %v1717_v52 = vrot.slane %v312_v50, %v1707_v43  ;;  %v145_v0 = vld [vmem:[#allocation2 + $0x338] sm:$0xff]  ;;  %v1336_v1 = vpack.c.bf16 %v140_v62, %v138_v61  ;;  %v142_v3 = vld [vmem:[#allocation2 + $0x320] sm:$0xff]  ;;  %v144_v4 = vld [vmem:[#allocation2 + $0x330] sm:$0xff] }
  0x20   :  { %v1338_v2 = vpack.c.bf16 %v145_v0, %v143_v63  ;;  %v147_v5 = vld [vmem:[#allocation2 + $0x348] sm:$0xff]  ;;  %v149_v6 = vld [vmem:[#allocation2 + $0x358] sm:$0xff]  ;;  %v1340_v7 = vpack.c.bf16 %v144_v4, %v142_v3  ;;  %v146_v9 = vld [vmem:[#allocation2 + $0x340] sm:$0xff] }
  0x21   :  { %v328_v58 = vcombine.high %v1717_v52, %v1717_v52  ;;  %v1342_v8 = vpack.c.bf16 %v149_v6, %v147_v5  ;;  %v148_v10 = vld [vmem:[#allocation2 + $0x350] sm:$0xff]  ;;  %v151_v11 = vld [vmem:[#allocation2 + $0x368] sm:$0xff]  ;;  %v153_v12 = vld [vmem:[#allocation2 + $0x378] sm:$0xff] }
  0x22   :  { %1317 = vmatpush1.bf16.msra.mxu0 %v1316_v25  ;;  %v1344_v13 = vpack.c.bf16 %v148_v10, %v146_v9  ;;  %v1346_v14 = vpack.c.bf16 %v153_v12, %v151_v11  ;;  %v150_v15 = vld [vmem:[#allocation2 + $0x360] sm:$0xff]  ;;  %v152_v16 = vld [vmem:[#allocation2 + $0x370] sm:$0xff]  ;;  %v155_v17 = vld [vmem:[#allocation2 + $0x388] sm:$0xff] }
  0x23   :  { %1319 = vmatprep.subr.bf16.mxu0 %v1318_v29  ;;  %489 = vmatprep.mubr.f32.mxu0 %v328_v58  ;;  %v157_v18 = vld [vmem:[#allocation2 + $0x398] sm:$0xff]  ;;  %v43_v19 = vld [vmem:[#allocation2 + $0x8] sm:$0xff]  ;;  %v42_v22 = vld [vmem:[#allocation2] sm:$0xff]  ;;  %v1348_v23 = vpack.c.bf16 %v152_v16, %v150_v15  ;;  %v1728_v16 = vrot.slane %v1712_v47, %v1707_v43 }
  0x24   :  { %v45_v20 = vld [vmem:[#allocation2 + $0x18] sm:$0xff]  ;;  %v154_v24 = vld [vmem:[#allocation2 + $0x380] sm:$0xff]  ;;  %v44_v25 = vld [vmem:[#allocation2 + $0x10] sm:$0xff]  ;;  %v1350_v26 = vpack.c.bf16 %v157_v18, %v155_v17 }
  0x25   :  { %v1238_v21 = vpack.c.bf16 %v45_v20, %v43_v19  ;;  %v156_v27 = vld [vmem:[#allocation2 + $0x390] sm:$0xff]  ;;  %v1240_v28 = vpack.c.bf16 %v44_v25, %v42_v22  ;;  %v47_v29 = vld [vmem:[#allocation2 + $0x28] sm:$0xff]  ;;  %v49_v30 = vld [vmem:[#allocation2 + $0x38] sm:$0xff] }
  0x26   :  { %1321 = vmatpush1.bf16.msra.mxu0 %v1320_v34  ;;  %v159_v31 = vld [vmem:[#allocation2 + $0x3a8] sm:$0xff]  ;;  %v161_v32 = vld [vmem:[#allocation2 + $0x3b8] sm:$0xff]  ;;  %v1242_v33 = vpack.c.bf16 %v49_v30, %v47_v29  ;;  %v46_v34 = vld [vmem:[#allocation2 + $0x20] sm:$0xff] }
  0x27   :  { %1323 = vmatprep.subr.bf16.mxu0 %v1322_v37  ;;  %1239 = vmatprep.subr.bf16.mxu1 %v1238_v21  ;;  %v48_v36 = vld [vmem:[#allocation2 + $0x30] sm:$0xff]  ;;  %v1352_v37 = vpack.c.bf16 %v156_v27, %v154_v24  ;;  %v158_v38 = vld [vmem:[#allocation2 + $0x3a0] sm:$0xff]  ;;  %v51_v40 = vld [vmem:[#allocation2 + $0x48] sm:$0xff] }
  0x28   :  { %1241 = vmatpush1.bf16.msra.mxu1 %v1240_v28  ;;  %v1244_v39 = vpack.c.bf16 %v48_v36, %v46_v34  ;;  %v53_v41 = vld [vmem:[#allocation2 + $0x58] sm:$0xff]  ;;  %v50_v46 = vld [vmem:[#allocation2 + $0x40] sm:$0xff]  ;;  %v52_v48 = vld [vmem:[#allocation2 + $0x50] sm:$0xff] }
  0x29   :  { %1243 = vmatprep.subr.bf16.mxu1 %v1242_v33  ;;  %v1246_v45 = vpack.c.bf16 %v53_v41, %v51_v40  ;;  %v163_v49 = vld [vmem:[#allocation2 + $0x3c8] sm:$0xff]  ;;  %v165_v50 = vld [vmem:[#allocation2 + $0x3d8] sm:$0xff]  ;;  %v162_v56 = vld [vmem:[#allocation2 + $0x3c0] sm:$0xff] }
  0x2a   :  { %1325 = vmatpush1.bf16.msra.mxu0 %v1324_v42  ;;  %v1354_v42 = vpack.c.bf16 %v161_v32, %v159_v31  ;;  %v57_v54 = vld [vmem:[#allocation2 + $0x78] sm:$0xff]  ;;  %v54_v58 = vld [vmem:[#allocation2 + $0x60] sm:$0xff]  ;;  %v164_v61 = vld [vmem:[#allocation2 + $0x3d0] sm:$0xff] }
  0x2b   :  { %1327 = vmatprep.subr.bf16.mxu0 %v1326_v44  ;;  %v160_v44 = vld [vmem:[#allocation2 + $0x3b0] sm:$0xff]  ;;  %v59_v62 = vld [vmem:[#allocation2 + $0x88] sm:$0xff]  ;;  %v61_v63 = vld [vmem:[#allocation2 + $0x98] sm:$0xff]  ;;  %v1360_v4 = vpack.c.bf16 %v164_v61, %v162_v56 }
  0x2c   :  { %1245 = vmatpush1.bf16.msra.mxu1 %v1244_v39  ;;  %v1356_v55 = vpack.c.bf16 %v160_v44, %v158_v38  ;;  %v167_v0 = vld [vmem:[#allocation2 + $0x3e8] sm:$0xff]  ;;  %v168_v5 = vld [vmem:[#allocation2 + $0x3f0] sm:$0xff]  ;;  %v1254_v6 = vpack.c.bf16 %v61_v63, %v59_v62  ;;  %v65_v12 = vld [vmem:[#allocation2 + $0xb8] sm:$0xff] }
  0x2d   :  { %1247 = vmatprep.subr.bf16.mxu1 %v1246_v45  ;;  %v1724_v10 = vld [vmem:[%s1989_s0 + $0x8] sm:$0xff]  ;;  %v62_v20 = vld [vmem:[#allocation2 + $0xa0] sm:$0xff]  ;;  %v64_v21 = vld [vmem:[#allocation2 + $0xb0] sm:$0xff] }
  0x2e   :  { %1329 = vmatpush1.bf16.msra.mxu0 %v1328_v51  ;;  %v55_v51 = vld [vmem:[#allocation2 + $0x68] sm:$0xff]  ;;  %v1732_v18 = vrot.slane %v1724_v10, %v1707_v43  ;;  %v172_v24 = vld [vmem:[#allocation2 + $0x410] sm:$0xff]  ;;  %v177_v47 = vld [vmem:[#allocation2 + $0x438] sm:$0xff]  ;;  %v1260_v29 = vpack.c.bf16 %v64_v21, %v62_v20 }
  0x2f   :  { %1331 = vmatprep.subr.bf16.mxu0 %v1330_v53  ;;  %v1248_v53 = vpack.c.bf16 %v52_v48, %v50_v46  ;;  %v1250_v57 = vpack.c.bf16 %v57_v54, %v55_v51  ;;  %v63_v11 = vld [vmem:[#allocation2 + $0xa8] sm:$0xff]  ;;  %v69_v28 = vld [vmem:[#allocation2 + $0xd8] sm:$0xff]  ;;  %v174_v31 = vld [vmem:[#allocation2 + $0x420] sm:$0xff] }
  0x30   :  { %v1258_v19 = vpack.c.bf16 %v65_v12, %v63_v11  ;;  %v175_v25 = vld [vmem:[#allocation2 + $0x428] sm:$0xff]  ;;  %v344_v32 = vcombine.high %v1732_v18, %v1732_v18  ;;  %v66_v33 = vld [vmem:[#allocation2 + $0xc0] sm:$0xff]  ;;  %v68_v34 = vld [vmem:[#allocation2 + $0xd0] sm:$0xff] }
  0x31   :  { %1249 = vmatpush1.bf16.msra.mxu1 %v1248_v53  ;;  %v67_v27 = vld [vmem:[#allocation2 + $0xc8] sm:$0xff]  ;;  %v1370_v36 = vpack.c.bf16 %v177_v47, %v175_v25  ;;  %v73_v40 = vld [vmem:[#allocation2 + $0xf8] sm:$0xff]  ;;  %v1264_v44 = vpack.c.bf16 %v68_v34, %v66_v33  ;;  %v178_v46 = vld [vmem:[#allocation2 + $0x440] sm:$0xff] }
  0x32   :  { %1333 = vmatpush1.bf16.msra.mxu0 %v1332_v59  ;;  %v56_v59 = vld [vmem:[#allocation2 + $0x70] sm:$0xff]  ;;  %1251 = vmatprep.subr.bf16.mxu1 %v1250_v57  ;;  %v1262_v38 = vpack.c.bf16 %v69_v28, %v67_v27  ;;  %v71_v39 = vld [vmem:[#allocation2 + $0xe8] sm:$0xff]  ;;  %v185_v57 = vld [vmem:[#allocation2 + $0x478] sm:$0xff] }
  0x33   :  { %1335 = vmatprep.subr.bf16.mxu0 %v1334_v60  ;;  %v1358_v60 = vpack.c.bf16 %v165_v50, %v163_v49  ;;  %v1252_v3 = vpack.c.bf16 %v56_v59, %v54_v58  ;;  %v179_v41 = vld [vmem:[#allocation2 + $0x448] sm:$0xff]  ;;  %v1266_v48 = vpack.c.bf16 %v73_v40, %v71_v39  ;;  %v70_v49 = vld [vmem:[#allocation2 + $0xe0] sm:$0xff]  ;;  %v72_v50 = vld [vmem:[#allocation2 + $0xf0] sm:$0xff] }
  0x34   :  { %v180_v53 = vld [vmem:[#allocation2 + $0x450] sm:$0xff]  ;;  %v75_v54 = vld [vmem:[#allocation2 + $0x108] sm:$0xff]  ;;  %v1268_v58 = vpack.c.bf16 %v72_v50, %v70_v49  ;;  %v182_v59 = vld [vmem:[#allocation2 + $0x460] sm:$0xff] }
  0x35   :  { %1253 = vmatpush1.bf16.msra.mxu1 %v1252_v3  ;;  %v183_v56 = vld [vmem:[#allocation2 + $0x468] sm:$0xff]  ;;  %v74_v61 = vld [vmem:[#allocation2 + $0x100] sm:$0xff]  ;;  %v76_v62 = vld [vmem:[#allocation2 + $0x110] sm:$0xff] }
  0x36   :  { %1337 = vmatpush1.bf16.msra.mxu0 %v1336_v1  ;;  %v169_v1 = vld [vmem:[#allocation2 + $0x3f8] sm:$0xff]  ;;  %1255 = vmatprep.subr.bf16.mxu1 %v1254_v6  ;;  %v1378_v63 = vpack.c.bf16 %v185_v57, %v183_v56  ;;  %v187_v3 = vld [vmem:[#allocation2 + $0x488] sm:$0xff]  ;;  %v80_v11 = vld [vmem:[#allocation2 + $0x130] sm:$0xff] }
  0x37   :  { %1339 = vmatprep.subr.bf16.mxu0 %v1338_v2  ;;  %v166_v2 = vld [vmem:[#allocation2 + $0x3e0] sm:$0xff]  ;;  %v1362_v9 = vpack.c.bf16 %v169_v1, %v167_v0  ;;  %v184_v0 = vld [vmem:[#allocation2 + $0x470] sm:$0xff]  ;;  %v79_v1 = vld [vmem:[#allocation2 + $0x128] sm:$0xff] }
  0x38   :  { %v1364_v17 = vpack.c.bf16 %v168_v5, %v166_v2  ;;  %v81_v2 = vld [vmem:[#allocation2 + $0x138] sm:$0xff]  ;;  %v1272_v5 = vpack.c.bf16 %v76_v62, %v74_v61  ;;  %v1380_v6 = vpack.c.bf16 %v184_v0, %v182_v59  ;;  %v84_v25 = vld [vmem:[#allocation2 + $0x150] sm:$0xff]  ;;  %v87_v27 = vld [vmem:[#allocation2 + $0x168] sm:$0xff] }
  0x39   :  { %v192_v47 = vld [vmem:[#allocation2 + $0x4b0] sm:$0xff]  ;;  %v89_v28 = vld [vmem:[#allocation2 + $0x178] sm:$0xff]  ;;  %v194_v33 = vld [vmem:[#allocation2 + $0x4c0] sm:$0xff] }
  0x3a   :  { %1341 = vmatpush1.bf16.msra.mxu0 %v1340_v7  ;;  %v58_v7 = vld [vmem:[#allocation2 + $0x80] sm:$0xff]  ;;  %v1282_v34 = vpack.c.bf16 %v89_v28, %v87_v27  ;;  %v196_v39 = vld [vmem:[#allocation2 + $0x4d0] sm:$0xff]  ;;  %v91_v40 = vld [vmem:[#allocation2 + $0x188] sm:$0xff] }
  0x3b   :  { %1343 = vmatprep.subr.bf16.mxu0 %v1342_v8  ;;  %v60_v8 = vld [vmem:[#allocation2 + $0x90] sm:$0xff]  ;;  %v90_v50 = vld [vmem:[#allocation2 + $0x180] sm:$0xff]  ;;  %v97_v56 = vld [vmem:[#allocation2 + $0x1b8] sm:$0xff] }
  0x3c   :  { %v1256_v15 = vpack.c.bf16 %v60_v8, %v58_v7  ;;  %v186_v7 = vld [vmem:[#allocation2 + $0x480] sm:$0xff]  ;;  %v1274_v8 = vpack.c.bf16 %v81_v2, %v79_v1  ;;  %v203_v57 = vld [vmem:[#allocation2 + $0x508] sm:$0xff]  ;;  %v204_v1 = vld [vmem:[#allocation2 + $0x510] sm:$0xff] }
  0x3d   :  { %v94_v62 = vld [vmem:[#allocation2 + $0x1a0] sm:$0xff]  ;;  %v99_v2 = vld [vmem:[#allocation2 + $0x1c8] sm:$0xff]  ;;  %v212_v27 = vld [vmem:[#allocation2 + $0x550] sm:$0xff] }
  0x3e   :  { %1345 = vmatpush1.bf16.msra.mxu0 %v1344_v13  ;;  %v171_v13 = vld [vmem:[#allocation2 + $0x408] sm:$0xff]  ;;  %1257 = vmatpush1.bf16.msra.mxu1 %v1256_v15  ;;  %v85_v15 = vld [vmem:[#allocation2 + $0x158] sm:$0xff]  ;;  %v660_v28 = vld [vmem:[%s1992_s3 + $0x80] sm:$0xff] }
  0x3f   :  { %1347 = vmatprep.subr.bf16.mxu0 %v1346_v14  ;;  %v173_v14 = vld [vmem:[#allocation2 + $0x418] sm:$0xff]  ;;  %1259 = vmatprep.subr.bf16.mxu1 %v1258_v19 }
  0x40   :  { %v1366_v22 = vpack.c.bf16 %v173_v14, %v171_v13  ;;  %v188_v13 = vld [vmem:[#allocation2 + $0x490] sm:$0xff]  ;;  %v83_v14 = vld [vmem:[#allocation2 + $0x148] sm:$0xff]  ;;  %v193_v19 = vld [vmem:[#allocation2 + $0x4b8] sm:$0xff] }
  0x41   :  { %v1384_v21 = vpack.c.bf16 %v188_v13, %v186_v7 }
  0x42   :  { %1349 = vmatpush1.bf16.msra.mxu0 %v1348_v23  ;;  %v170_v23 = vld [vmem:[#allocation2 + $0x400] sm:$0xff]  ;;  %1261 = vmatpush1.bf16.msra.mxu1 %v1260_v29  ;;  %v195_v29 = vld [vmem:[#allocation2 + $0x4c8] sm:$0xff] }
  0x43   :  { %1351 = vmatprep.subr.bf16.mxu0 %v1350_v26  ;;  %v327_v26 = vcombine.high %v1728_v16, %v1728_v16  ;;  %v1368_v30 = vpack.c.bf16 %v172_v24, %v170_v23  ;;  %1263 = vmatprep.subr.bf16.mxu1 %v1262_v38  ;;  %v1278_v23 = vpack.c.bf16 %v85_v15, %v83_v14  ;;  %v82_v24 = vld [vmem:[#allocation2 + $0x140] sm:$0xff]  ;;  %v208_v14 = vld [vmem:[#allocation2 + $0x530] sm:$0xff]  ;;  %v103_v15 = vld [vmem:[#allocation2 + $0x1e8] sm:$0xff] }
  0x45   :  { %418 = vmatprep.mubr.f32.mxu1 %v327_v26 }
  0x46   :  { %1353 = vmatpush1.bf16.msra.mxu0 %v1352_v37  ;;  %v176_v37 = vld [vmem:[#allocation2 + $0x430] sm:$0xff]  ;;  %1265 = vmatpush1.bf16.msra.mxu1 %v1264_v44  ;;  %v201_v44 = vld [vmem:[#allocation2 + $0x4f8] sm:$0xff] }
  0x47   :  { %1355 = vmatprep.subr.bf16.mxu0 %v1354_v42  ;;  %v181_v42 = vld [vmem:[#allocation2 + $0x458] sm:$0xff]  ;;  %v1372_v45 = vpack.c.bf16 %v176_v37, %v174_v31  ;;  %1267 = vmatprep.subr.bf16.mxu1 %v1266_v48  ;;  %v1280_v31 = vpack.c.bf16 %v84_v25, %v82_v24  ;;  %v88_v37 = vld [vmem:[#allocation2 + $0x170] sm:$0xff]  ;;  %v198_v48 = vld [vmem:[#allocation2 + $0x4e0] sm:$0xff] }
  0x48   :  { %v1374_v51 = vpack.c.bf16 %v181_v42, %v179_v41  ;;  %v93_v41 = vld [vmem:[#allocation2 + $0x198] sm:$0xff]  ;;  %v199_v42 = vld [vmem:[#allocation2 + $0x4e8] sm:$0xff]  ;;  %v102_v25 = vld [vmem:[#allocation2 + $0x1e0] sm:$0xff] }
  0x49   :  { %v1286_v49 = vpack.c.bf16 %v93_v41, %v91_v40  ;;  %v216_v40 = vld [vmem:[#allocation2 + $0x570] sm:$0xff] }
  0x4a   :  { %1357 = vmatpush1.bf16.msra.mxu0 %v1356_v55  ;;  %v77_v55 = vld [vmem:[#allocation2 + $0x118] sm:$0xff]  ;;  %1269 = vmatpush1.bf16.msra.mxu1 %v1268_v58  ;;  %v662_v41 = vld [vmem:[%s1992_s3 + $0x90] sm:$0xff] }
  0x4b   :  { %1359 = vmatprep.subr.bf16.mxu0 %v1358_v60  ;;  %v1270_v60 = vpack.c.bf16 %v77_v55, %v75_v54  ;;  %v200_v54 = vld [vmem:[#allocation2 + $0x4f0] sm:$0xff]  ;;  %v95_v55 = vld [vmem:[#allocation2 + $0x1a8] sm:$0xff]  ;;  %v205_v58 = vld [vmem:[#allocation2 + $0x518] sm:$0xff] }
  0x4c   :  { %v1396_v59 = vpack.c.bf16 %v200_v54, %v198_v48  ;;  %v1290_v61 = vpack.c.bf16 %v97_v56, %v95_v55  ;;  %v1398_v0 = vpack.c.bf16 %v205_v58, %v203_v57  ;;  %v220_v55 = vld [vmem:[#allocation2 + $0x590] sm:$0xff]  ;;  %v664_v56 = vld [vmem:[%s1992_s3 + $0xa0] sm:$0xff]  ;;  %v665_v57 = vld [vmem:[%s1992_s3 + $0xa8] sm:$0xff] }
  0x4d   :  { %1271 = vmatprep.subr.bf16.mxu1 %v1270_v60  ;;  %v202_v60 = vld [vmem:[#allocation2 + $0x500] sm:$0xff]  ;;  %v223_v58 = vld [vmem:[#allocation2 + $0x5a8] sm:$0xff] }
  0x4e   :  { %1361 = vmatpush1.bf16.msra.mxu0 %v1360_v4  ;;  %v189_v4 = vld [vmem:[#allocation2 + $0x498] sm:$0xff]  ;;  %1273 = vmatpush1.bf16.msra.mxu1 %v1272_v5  ;;  %v1400_v7 = vpack.c.bf16 %v204_v1, %v202_v60 }
  0x4f   :  { %1363 = vmatprep.subr.bf16.mxu0 %v1362_v9  ;;  %v78_v9 = vld [vmem:[#allocation2 + $0x120] sm:$0xff]  ;;  %v1382_v12 = vpack.c.bf16 %v189_v4, %v187_v3  ;;  %1275 = vmatprep.subr.bf16.mxu1 %v1274_v8  ;;  %v101_v3 = vld [vmem:[#allocation2 + $0x1d8] sm:$0xff]  ;;  %v207_v4 = vld [vmem:[#allocation2 + $0x528] sm:$0xff] }
  0x50   :  { %v1276_v20 = vpack.c.bf16 %v80_v11, %v78_v9  ;;  %v209_v5 = vld [vmem:[#allocation2 + $0x538] sm:$0xff]  ;;  %v206_v8 = vld [vmem:[#allocation2 + $0x520] sm:$0xff]  ;;  %v1294_v9 = vpack.c.bf16 %v101_v3, %v99_v2  ;;  %v224_v2 = vld [vmem:[#allocation2 + $0x5b0] sm:$0xff] }
  0x51   :  { %v98_v11 = vld [vmem:[#allocation2 + $0x1c0] sm:$0xff]  ;;  %v1402_v13 = vpack.c.bf16 %v209_v5, %v207_v4  ;;  %v667_v3 = vld [vmem:[%s1992_s3 + $0xb8] sm:$0xff]  ;;  %v227_v4 = vld [vmem:[#allocation2 + $0x5c8] sm:$0xff] }
  0x52   :  { %1365 = vmatpush1.bf16.msra.mxu0 %v1364_v17  ;;  %v191_v17 = vld [vmem:[#allocation2 + $0x4a8] sm:$0xff]  ;;  %1277 = vmatpush1.bf16.msra.mxu1 %v1276_v20  ;;  %v213_v20 = vld [vmem:[#allocation2 + $0x558] sm:$0xff] }
  0x53   :  { %1367 = vmatprep.subr.bf16.mxu0 %v1366_v22  ;;  %v190_v22 = vld [vmem:[#allocation2 + $0x4a0] sm:$0xff]  ;;  %v1386_v26 = vpack.c.bf16 %v193_v19, %v191_v17  ;;  %1279 = vmatprep.subr.bf16.mxu1 %v1278_v23  ;;  %v105_v17 = vld [vmem:[#allocation2 + $0x1f8] sm:$0xff]  ;;  %v211_v19 = vld [vmem:[#allocation2 + $0x548] sm:$0xff] }
  0x54   :  { %v210_v23 = vld [vmem:[#allocation2 + $0x540] sm:$0xff]  ;;  %v1298_v24 = vpack.c.bf16 %v105_v17, %v103_v15  ;;  %v229_v5 = vld [vmem:[#allocation2 + $0x5d8] sm:$0xff]  ;;  %v669_v17 = vld [vmem:[%s1992_s3 + $0xc8] sm:$0xff] }
  0x55   :  { %490 = vmatmul.mubr.f32.vlgmr.msra.gmra.mrb[0].mxu0 %v1717_v52  ;;  %v1376_v52 = vpack.c.bf16 %v180_v53, %v178_v46  ;;  %v1392_v46 = vpack.c.bf16 %v196_v39, %v194_v33  ;;  %v1394_v53 = vpack.c.bf16 %v201_v44, %v199_v42  ;;  %v1408_v33 = vpack.c.bf16 %v212_v27, %v210_v23  ;;  %v663_v42 = vld [vmem:[%s1992_s3 + $0x98] sm:$0xff]  ;;  %v219_v44 = vld [vmem:[#allocation2 + $0x588] sm:$0xff]  ;;  %v668_v15 = vld [vmem:[%s1992_s3 + $0xc0] sm:$0xff] }
  0x56   :  { %1369 = vmatpush1.bf16.msra.mxu0 %v1368_v30  ;;  %560 = vmatprep.mubr.f32.mxu0 %v344_v32  ;;  %v197_v30 = vld [vmem:[#allocation2 + $0x4d8] sm:$0xff]  ;;  %v1388_v32 = vpack.c.bf16 %v192_v47, %v190_v22  ;;  %v1404_v22 = vpack.c.bf16 %v208_v14, %v206_v8  ;;  %v1406_v47 = vpack.c.bf16 %v213_v20, %v211_v19  ;;  %v226_v8 = vld [vmem:[#allocation2 + $0x5c0] sm:$0xff]  ;;  %v228_v14 = vld [vmem:[#allocation2 + $0x5d0] sm:$0xff] }
  0x57   :  { %1371 = vmatprep.subr.bf16.mxu0 %v1370_v36  ;;  %v86_v36 = vld [vmem:[#allocation2 + $0x160] sm:$0xff]  ;;  %v1390_v38 = vpack.c.bf16 %v197_v30, %v195_v29  ;;  %1281 = vmatpush1.bf16.msra.mxu1 %v1280_v31  ;;  %v661_v29 = vld [vmem:[%s1992_s3 + $0x88] sm:$0xff]  ;;  %v217_v31 = vld [vmem:[#allocation2 + $0x578] sm:$0xff] }
  0x58   :  { %1283 = vmatprep.subr.bf16.mxu1 %v1282_v34  ;;  %v215_v30 = vld [vmem:[#allocation2 + $0x568] sm:$0xff]  ;;  %v214_v34 = vld [vmem:[#allocation2 + $0x560] sm:$0xff]  ;;  %v233_v20 = vld [vmem:[#allocation2 + $0x5f8] sm:$0xff] }
  0x59   :  { %v1410_v39 = vpack.c.bf16 %v217_v31, %v215_v30  ;;  %v1412_v48 = vpack.c.bf16 %v216_v40, %v214_v34  ;;  %v231_v19 = vld [vmem:[#allocation2 + $0x5e8] sm:$0xff]  ;;  %v230_v23 = vld [vmem:[#allocation2 + $0x5e0] sm:$0xff]  ;;  %v237_v31 = vld [vmem:[#allocation2 + $0x618] sm:$0xff] }
  0x5a   :  { %1373 = vmatpush1.bf16.msra.mxu0 %v1372_v45  ;;  %v1284_v45 = vpack.c.bf16 %v88_v37, %v86_v36  ;;  %v1494_v36 = vpack.c.bf16 %v661_v29, %v660_v28  ;;  %v644_v37 = vld [vmem:[%s1992_s3] sm:$0xff]  ;;  %v1426_v27 = vpack.c.bf16 %v233_v20, %v231_v19  ;;  %v232_v28 = vld [vmem:[#allocation2 + $0x5f0] sm:$0xff]  ;;  %v235_v30 = vld [vmem:[#allocation2 + $0x608] sm:$0xff] }
  0x5b   :  { %1375 = vmatprep.subr.bf16.mxu0 %v1374_v51  ;;  %v92_v51 = vld [vmem:[#allocation2 + $0x190] sm:$0xff]  ;;  %v239_v40 = vld [vmem:[#allocation2 + $0x628] sm:$0xff]  ;;  %v262_v19 = vld [vmem:[#allocation2 + $0x6e0] sm:$0xff] }
  0x5c   :  { %1285 = vmatpush1.bf16.msra.mxu1 %v1284_v45  ;;  %v221_v45 = vld [vmem:[#allocation2 + $0x598] sm:$0xff]  ;;  %v670_v29 = vld [vmem:[%s1992_s3 + $0xd0] sm:$0xff] }
  0x5d   :  { %1287 = vmatprep.subr.bf16.mxu1 %v1286_v49  ;;  %v218_v49 = vld [vmem:[#allocation2 + $0x580] sm:$0xff]  ;;  %v1414_v54 = vpack.c.bf16 %v221_v45, %v219_v44  ;;  %v264_v20 = vld [vmem:[#allocation2 + $0x6f0] sm:$0xff] }
  0x5e   :  { %1377 = vmatpush1.bf16.msra.mxu0 %v1376_v52  ;;  %v1288_v52 = vpack.c.bf16 %v92_v51, %v90_v50  ;;  %v1498_v50 = vpack.c.bf16 %v663_v42, %v662_v41  ;;  %v646_v51 = vld [vmem:[%s1992_s3 + $0x10] sm:$0xff]  ;;  %v1416_v60 = vpack.c.bf16 %v220_v55, %v218_v49  ;;  %v241_v41 = vld [vmem:[#allocation2 + $0x638] sm:$0xff]  ;;  %v247_v55 = vld [vmem:[#allocation2 + $0x668] sm:$0xff] }
  0x5f   :  { %1379 = vmatprep.subr.bf16.mxu0 %v1378_v63  ;;  %v96_v63 = vld [vmem:[#allocation2 + $0x1b0] sm:$0xff]  ;;  %v1434_v45 = vpack.c.bf16 %v241_v41, %v239_v40  ;;  %v245_v49 = vld [vmem:[#allocation2 + $0x658] sm:$0xff] }
  0x60   :  { %1289 = vmatpush1.bf16.msra.mxu1 %v1288_v52  ;;  %v225_v52 = vld [vmem:[#allocation2 + $0x5b8] sm:$0xff] }
  0x61   :  { %1291 = vmatprep.subr.bf16.mxu1 %v1290_v61  ;;  %v222_v61 = vld [vmem:[#allocation2 + $0x5a0] sm:$0xff]  ;;  %v1418_v1 = vpack.c.bf16 %v225_v52, %v223_v58  ;;  %v281_v40 = vld [vmem:[#allocation2 + $0x778] sm:$0xff] }
  0x62   :  { %1381 = vmatpush1.bf16.msra.mxu0 %v1380_v6  ;;  %v1292_v6 = vpack.c.bf16 %v96_v63, %v94_v62  ;;  %v1502_v62 = vpack.c.bf16 %v665_v57, %v664_v56  ;;  %v648_v63 = vld [vmem:[%s1992_s3 + $0x20] sm:$0xff]  ;;  %v249_v56 = vld [vmem:[#allocation2 + $0x678] sm:$0xff] }
  0x63   :  { %1383 = vmatprep.subr.bf16.mxu0 %v1382_v12  ;;  %v100_v12 = vld [vmem:[#allocation2 + $0x1d0] sm:$0xff]  ;;  %v1442_v58 = vpack.c.bf16 %v249_v56, %v247_v55  ;;  %v246_v52 = vld [vmem:[#allocation2 + $0x660] sm:$0xff] }
  0x64   :  { %1293 = vmatpush1.bf16.msra.mxu1 %v1292_v6 }
  0x65   :  { %1295 = vmatprep.subr.bf16.mxu1 %v1294_v9 }
  0x66   :  { %1385 = vmatpush1.bf16.msra.mxu0 %v1384_v21  ;;  %v1296_v21 = vpack.c.bf16 %v100_v12, %v98_v11  ;;  %v650_v11 = vld [vmem:[%s1992_s3 + $0x30] sm:$0xff]  ;;  %v651_v12 = vld [vmem:[%s1992_s3 + $0x38] sm:$0xff] }
  0x67   :  { %1387 = vmatprep.subr.bf16.mxu0 %v1386_v26  ;;  %v104_v26 = vld [vmem:[#allocation2 + $0x1f0] sm:$0xff] }
  0x68   :  { %1297 = vmatpush1.bf16.msra.mxu1 %v1296_v21  ;;  %v1508_v21 = vpack.c.bf16 %v651_v12, %v650_v11  ;;  %v258_v11 = vld [vmem:[#allocation2 + $0x6c0] sm:$0xff]  ;;  %v260_v12 = vld [vmem:[#allocation2 + $0x6d0] sm:$0xff] }
  0x69   :  { %1299 = vmatprep.subr.bf16.mxu1 %v1298_v24  ;;  %v329_v24 = vcombine.high %v1724_v10, %v1724_v10  ;;  %v671_v10 = vld [vmem:[%s1992_s3 + $0xd8] sm:$0xff] }
  0x6a   :  { %1389 = vmatpush1.bf16.msra.mxu0 %v1388_v32  ;;  %v1300_v32 = vpack.c.bf16 %v104_v26, %v102_v25  ;;  %v1510_v25 = vpack.c.bf16 %v669_v17, %v668_v15  ;;  %v652_v26 = vld [vmem:[%s1992_s3 + $0x40] sm:$0xff]  ;;  %v1456_v15 = vpack.c.bf16 %v260_v12, %v258_v11 }
  0x6b   :  { %1391 = vmatprep.subr.bf16.mxu0 %v1390_v38  ;;  %v645_v38 = vld [vmem:[%s1992_s3 + $0x8] sm:$0xff]  ;;  %v1809_v34 = vrot.slane %v329_v24, %v1707_v43  ;;  %v240_v43 = vld [vmem:[#allocation2 + $0x630] sm:$0xff]  ;;  %v656_v12 = vld [vmem:[%s1992_s3 + $0x60] sm:$0xff] }
  0x6c   :  { %1301 = vmatpush1.bf16.msra.mxu1 %v1300_v32 }
  0x6d   :  { %1495 = vmatprep.subr.bf16.mxu1 %v1494_v36  ;;  %v1514_v36 = vpack.c.bf16 %v671_v10, %v670_v29  ;;  %v345_v44 = vcombine.high %v1809_v34, %v1809_v34  ;;  %v270_v10 = vld [vmem:[#allocation2 + $0x720] sm:$0xff] }
  0x6e   :  { %1393 = vmatpush1.bf16.msra.mxu0 %v1392_v46  ;;  %v1496_v46 = vpack.c.bf16 %v645_v38, %v644_v37  ;;  %v1430_v37 = vpack.c.bf16 %v237_v31, %v235_v30  ;;  %v234_v38 = vld [vmem:[#allocation2 + $0x600] sm:$0xff]  ;;  %v272_v30 = vld [vmem:[#allocation2 + $0x730] sm:$0xff]  ;;  %v275_v31 = vld [vmem:[#allocation2 + $0x748] sm:$0xff] }
  0x6f   :  { %1395 = vmatprep.subr.bf16.mxu0 %v1394_v53  ;;  %v647_v53 = vld [vmem:[%s1992_s3 + $0x18] sm:$0xff]  ;;  %419 = vmatmul.mubr.f32.vlgmr.msra.gmra.mrb[0].mxu1 %v1728_v16  ;;  %v666_v16 = vld [vmem:[%s1992_s3 + $0xb0] sm:$0xff] }
  0x70   :  { %1497 = vmatpush3.bf16.msra.mxu1 %v1496_v46  ;;  %v1506_v9 = vpack.c.bf16 %v667_v3, %v666_v16  ;;  %v238_v46 = vld [vmem:[#allocation2 + $0x620] sm:$0xff] }
  0x71   :  { %1499 = vmatprep.subr.bf16.mxu1 %v1498_v50  ;;  %v1436_v50 = vpack.c.bf16 %v240_v43, %v238_v46  ;;  %v283_v46 = vld [vmem:[#allocation2 + $0x788] sm:$0xff]  ;;  %v285_v43 = vld [vmem:[#allocation2 + $0x798] sm:$0xff] }
  0x72   :  { %1397 = vmatpush1.bf16.msra.mxu0 %v1396_v59  ;;  %v1500_v59 = vpack.c.bf16 %v647_v53, %v646_v51  ;;  %v242_v53 = vld [vmem:[#allocation2 + $0x640] sm:$0xff] }
  0x73   :  { %1399 = vmatprep.subr.bf16.mxu0 %v1398_v0  ;;  %v649_v0 = vld [vmem:[%s1992_s3 + $0x28] sm:$0xff] }
  0x74   :  { %1501 = vmatpush3.bf16.msra.mxu1 %v1500_v59  ;;  %v1504_v6 = vpack.c.bf16 %v649_v0, %v648_v63  ;;  %v248_v59 = vld [vmem:[#allocation2 + $0x670] sm:$0xff]  ;;  %v250_v63 = vld [vmem:[#allocation2 + $0x680] sm:$0xff] }
  0x75   :  { %1503 = vmatprep.subr.bf16.mxu1 %v1502_v62  ;;  %v1444_v62 = vpack.c.bf16 %v248_v59, %v246_v52  ;;  %v252_v0 = vld [vmem:[#allocation2 + $0x690] sm:$0xff]  ;;  %v291_v52 = vld [vmem:[#allocation2 + $0x7c8] sm:$0xff]  ;;  %v293_v59 = vld [vmem:[#allocation2 + $0x7d8] sm:$0xff] }
  0x76   :  { %1401 = vmatpush1.bf16.msra.mxu0 %v1400_v7  ;;  %v1420_v7 = vpack.c.bf16 %v224_v2, %v222_v61  ;;  %v253_v61 = vld [vmem:[#allocation2 + $0x698] sm:$0xff]  ;;  %v1448_v16 = vpack.c.bf16 %v252_v0, %v250_v63  ;;  %v295_v63 = vld [vmem:[#allocation2 + $0x7e8] sm:$0xff] }
  0x77   :  { %1403 = vmatprep.subr.bf16.mxu0 %v1402_v13  ;;  %v1422_v13 = vpack.c.bf16 %v229_v5, %v227_v4  ;;  %v257_v2 = vld [vmem:[#allocation2 + $0x6b8] sm:$0xff]  ;;  %v254_v4 = vld [vmem:[#allocation2 + $0x6a0] sm:$0xff]  ;;  %v256_v5 = vld [vmem:[#allocation2 + $0x6b0] sm:$0xff] }
  0x78   :  { %1505 = vmatpush3.bf16.msra.mxu1 %v1504_v6  ;;  %v259_v6 = vld [vmem:[#allocation2 + $0x6c8] sm:$0xff]  ;;  %v297_v0 = vld [vmem:[#allocation2 + $0x7f8] sm:$0xff] }
  0x79   :  { %1507 = vmatprep.subr.bf16.mxu1 %v1506_v9 }
  0x7a   :  { %1405 = vmatpush1.bf16.msra.mxu0 %v1404_v22  ;;  %v1424_v22 = vpack.c.bf16 %v228_v14, %v226_v8  ;;  %v1452_v8 = vpack.c.bf16 %v256_v5, %v254_v4  ;;  %v265_v14 = vld [vmem:[#allocation2 + $0x6f8] sm:$0xff]  ;;  %v654_v5 = vld [vmem:[%s1992_s3 + $0x50] sm:$0xff] }
  0x7b   :  { %1407 = vmatprep.subr.bf16.mxu0 %v1406_v47  ;;  %v653_v47 = vld [vmem:[%s1992_s3 + $0x48] sm:$0xff] }
  0x7c   :  { %1509 = vmatpush3.bf16.msra.mxu1 %v1508_v21  ;;  %v1512_v32 = vpack.c.bf16 %v653_v47, %v652_v26  ;;  %v267_v21 = vld [vmem:[#allocation2 + $0x708] sm:$0xff]  ;;  %v268_v26 = vld [vmem:[#allocation2 + $0x710] sm:$0xff] }
  0x7d   :  { %1511 = vmatprep.subr.bf16.mxu1 %v1510_v25  ;;  %v266_v25 = vld [vmem:[#allocation2 + $0x700] sm:$0xff]  ;;  %v271_v47 = vld [vmem:[#allocation2 + $0x728] sm:$0xff] }
  0x7e   :  { %1409 = vmatpush1.bf16.msra.mxu0 %v1408_v33  ;;  %v1428_v33 = vpack.c.bf16 %v232_v28, %v230_v23  ;;  %v1460_v23 = vpack.c.bf16 %v264_v20, %v262_v19  ;;  %v1464_v28 = vpack.c.bf16 %v268_v26, %v266_v25  ;;  %v658_v19 = vld [vmem:[%s1992_s3 + $0x70] sm:$0xff]  ;;  %v659_v20 = vld [vmem:[%s1992_s3 + $0x78] sm:$0xff]  ;;  %v1847_v25 = vsub.s32 0, %v1704_v35  ;;  %v298_v26 = vld [vmem:[%s1991_s2] sm:$0x3] }
  0x7f   :  { %1411 = vmatprep.subr.bf16.mxu0 %v1410_v39  ;;  %v236_v39 = vld [vmem:[#allocation2 + $0x610] sm:$0xff] }
  0x80   :  { %1513 = vmatpush3.bf16.msra.mxu1 %v1512_v32  ;;  %v1432_v42 = vpack.c.bf16 %v236_v39, %v234_v38  ;;  %v277_v32 = vld [vmem:[#allocation2 + $0x758] sm:$0xff]  ;;  %v276_v38 = vld [vmem:[#allocation2 + $0x750] sm:$0xff]  ;;  %v279_v39 = vld [vmem:[#allocation2 + $0x768] sm:$0xff] }
  0x81   :  { %1515 = vmatprep.subr.bf16.mxu1 %v1514_v36  ;;  %v1470_v36 = vpack.c.bf16 %v277_v32, %v275_v31 }
  0x82   :  { %1413 = vmatpush1.bf16.msra.mxu0 %v1412_v48  ;;  %v243_v48 = vld [vmem:[#allocation2 + $0x648] sm:$0xff] }
  0x83   :  { %1415 = vmatprep.subr.bf16.mxu0 %v1414_v54  ;;  %v1438_v51 = vpack.c.bf16 %v245_v49, %v243_v48  ;;  %v244_v54 = vld [vmem:[#allocation2 + $0x650] sm:$0xff]  ;;  %v1478_v49 = vpack.c.bf16 %v285_v43, %v283_v46  ;;  %v759_v46 = vld [vmem:[%s1993_s4 + $0x20] sm:$0xff]  ;;  %v760_v43 = vld [vmem:[%s1993_s4 + $0x28] sm:$0xff] }
  0x84   :  { %v1440_v57 = vpack.c.bf16 %v244_v54, %v242_v53  ;;  %v287_v53 = vld [vmem:[#allocation2 + $0x7a8] sm:$0xff]  ;;  %v289_v54 = vld [vmem:[#allocation2 + $0x7b8] sm:$0xff] }
  0x85   :  { %v1482_v56 = vpack.c.bf16 %v289_v54, %v287_v53  ;;  %v763_v53 = vld [vmem:[%s1993_s4 + $0x40] sm:$0xff]  ;;  %v764_v54 = vld [vmem:[%s1993_s4 + $0x48] sm:$0xff] }
  0x86   :  { %1417 = vmatpush1.bf16.msra.mxu0 %v1416_v60  ;;  %v251_v60 = vld [vmem:[#allocation2 + $0x688] sm:$0xff] }
  0x87   :  { %1419 = vmatprep.subr.bf16.mxu0 %v1418_v1  ;;  %v255_v1 = vld [vmem:[#allocation2 + $0x6a8] sm:$0xff] }
  0x88   :  { %v1450_v3 = vpack.c.bf16 %v257_v2, %v255_v1  ;;  %v1490_v2 = vpack.c.bf16 %v297_v0, %v295_v63  ;;  %v1651_v63 = vmov 0.0  }
  0x8a   :  { %1421 = vmatpush1.bf16.msra.mxu0 %v1420_v7  ;;  %v261_v7 = vld [vmem:[#allocation2 + $0x6d8] sm:$0xff] }
  0x8b   :  { %1423 = vmatprep.subr.bf16.mxu0 %v1422_v13  ;;  %v1454_v9 = vpack.c.bf16 %v261_v7, %v259_v6  ;;  %v263_v13 = vld [vmem:[#allocation2 + $0x6e8] sm:$0xff]  ;;  %v655_v6 = vld [vmem:[%s1992_s3 + $0x58] sm:$0xff] }
  0x8c   :  { %v1458_v17 = vpack.c.bf16 %v265_v14, %v263_v13  ;;  %v1516_v7 = vpack.c.bf16 %v655_v6, %v654_v5  ;;  %v657_v13 = vld [vmem:[%s1992_s3 + $0x68] sm:$0xff]  ;;  %v674_v14 = vld [vmem:[%s1992_s3 + $0xf0] sm:$0xff] }
  0x8e   :  { %1425 = vmatpush1.bf16.msra.mxu0 %v1424_v22  ;;  %v269_v22 = vld [vmem:[#allocation2 + $0x718] sm:$0xff]  ;;  %1517 = vmatpush3.bf16.msra.mxu1 %v1516_v7 }
  0x8f   :  { %1427 = vmatprep.subr.bf16.mxu0 %v1426_v27  ;;  %v1462_v24 = vpack.c.bf16 %v269_v22, %v267_v21  ;;  %v273_v27 = vld [vmem:[#allocation2 + $0x738] sm:$0xff]  ;;  %v1524_v21 = vpack.c.bf16 %v659_v20, %v658_v19  ;;  %v1649_v22 = vmov 0.0|0.0  }
  0x90   :  { %v1466_v29 = vpack.c.bf16 %v273_v27, %v271_v47  ;;  %v306_v47 = vsub.s32 1, %v1704_v35  ;;  %v303_v27 = vrot.slane %v298_v26, %v1847_v25 }
  0x92   :  { %1429 = vmatpush1.bf16.msra.mxu0 %v1428_v33  ;;  %v1468_v33 = vpack.c.bf16 %v272_v30, %v270_v10 }
  0x93   :  { %1431 = vmatprep.subr.bf16.mxu0 %v1430_v37  ;;  %v274_v37 = vld [vmem:[#allocation2 + $0x740] sm:$0xff] }
  0x94   :  { %v1472_v41 = vpack.c.bf16 %v276_v38, %v274_v37  ;;  %v756_v37 = vld [vmem:[%s1993_s4 + $0x8] sm:$0xff] }
  0x95   :  { %561 = vmatmul.mubr.f32.vlgmr.msra.gmra.mrb[0].mxu0 %v1732_v18  ;;  %v1446_v18 = vpack.c.bf16 %v253_v61, %v251_v60  ;;  %v1486_v61 = vpack.c.bf16 %v293_v59, %v291_v52  ;;  %v767_v52 = vld [vmem:[%s1993_s4 + $0x60] sm:$0xff]  ;;  %v768_v59 = vld [vmem:[%s1993_s4 + $0x68] sm:$0xff] }
  0x96   :  { %1433 = vmatpush1.bf16.msra.mxu0 %v1432_v42  ;;  %631 = vmatprep.mubr.f32.mxu0 %v345_v44  ;;  %v1474_v42 = vpack.c.bf16 %v281_v40, %v279_v39  ;;  %v278_v44 = vld [vmem:[#allocation2 + $0x760] sm:$0xff] }
  0x97   :  { %1435 = vmatprep.subr.bf16.mxu0 %v1434_v45  ;;  %v280_v45 = vld [vmem:[#allocation2 + $0x770] sm:$0xff] }
  0x98   :  { %v1476_v48 = vpack.c.bf16 %v280_v45, %v278_v44 }
  0x9a   :  { %1437 = vmatpush1.bf16.msra.mxu0 %v1436_v50  ;;  %v282_v50 = vld [vmem:[#allocation2 + $0x780] sm:$0xff] }
  0x9b   :  { %1439 = vmatprep.subr.bf16.mxu0 %v1438_v51  ;;  %v284_v51 = vld [vmem:[#allocation2 + $0x790] sm:$0xff] }
  0x9c   :  { %v1480_v55 = vpack.c.bf16 %v284_v51, %v282_v50  ;;  %v762_v50 = vld [vmem:[%s1993_s4 + $0x38] sm:$0xff] }
  0x9e   :  { %1441 = vmatpush1.bf16.msra.mxu0 %v1440_v57  ;;  %v286_v57 = vld [vmem:[#allocation2 + $0x7a0] sm:$0xff] }
  0x9f   :  { %1443 = vmatprep.subr.bf16.mxu0 %v1442_v58  ;;  %v288_v58 = vld [vmem:[#allocation2 + $0x7b0] sm:$0xff] }
  0xa0   :  { %v1484_v60 = vpack.c.bf16 %v288_v58, %v286_v57  ;;  %v766_v57 = vld [vmem:[%s1993_s4 + $0x58] sm:$0xff] }
  0xa2   :  { %1445 = vmatpush1.bf16.msra.mxu0 %v1444_v62  ;;  %v290_v62 = vld [vmem:[#allocation2 + $0x7c0] sm:$0xff] }
  0xa3   :  { %1447 = vmatprep.subr.bf16.mxu0 %v1446_v18  ;;  %v292_v18 = vld [vmem:[#allocation2 + $0x7d0] sm:$0xff] }
  0xa4   :  { %v1488_v1 = vpack.c.bf16 %v292_v18, %v290_v62  ;;  %v770_v62 = vld [vmem:[%s1993_s4 + $0x78] sm:$0xff] }
  0xa6   :  { %1449 = vmatpush1.bf16.msra.mxu0 %v1448_v16  ;;  %v294_v16 = vld [vmem:[#allocation2 + $0x7e0] sm:$0xff] }
  0xa7   :  { %1451 = vmatprep.subr.bf16.mxu0 %v1450_v3  ;;  %v296_v3 = vld [vmem:[#allocation2 + $0x7f0] sm:$0xff] }
  0xa8   :  { %v1492_v4 = vpack.c.bf16 %v296_v3, %v294_v16 }
  0xaa   :  { %1453 = vmatpush1.bf16.msra.mxu0 %v1452_v8  ;;  %v672_v8 = vld [vmem:[%s1992_s3 + $0xe0] sm:$0xff] }
  0xab   :  { %1455 = vmatprep.subr.bf16.mxu0 %v1454_v9  ;;  %v673_v9 = vld [vmem:[%s1992_s3 + $0xe8] sm:$0xff] }
  0xac   :  { %v1518_v11 = vpack.c.bf16 %v673_v9, %v672_v8 }
  0xae   :  { %1457 = vmatpush1.bf16.msra.mxu0 %v1456_v15  ;;  %1519 = vmatprep.subr.bf16.mxu1 %v1518_v11  ;;  %v675_v15 = vld [vmem:[%s1992_s3 + $0xf8] sm:$0xff] }
  0xaf   :  { %1459 = vmatprep.subr.bf16.mxu0 %v1458_v17  ;;  %v1522_v17 = vpack.c.bf16 %v675_v15, %v674_v14 }
  0xb2   :  { %1461 = vmatpush1.bf16.msra.mxu0 %v1460_v23 }
  0xb3   :  { %1463 = vmatprep.subr.bf16.mxu0 %v1462_v24 }
  0xb6   :  { %1465 = vmatpush1.bf16.msra.mxu0 %v1464_v28  ;;  %v307_v28 = vrot.slane %v298_v26, %v306_v47  ;;  %v947_v26 = vld [vmem:[%s1995_s6 + $0x8] sm:$0xff] }
  0xb7   :  { %1467 = vmatprep.subr.bf16.mxu0 %v1466_v29 }
  0xba   :  { %1469 = vmatpush1.bf16.msra.mxu0 %v1468_v33 }
  0xbb   :  { %1471 = vmatprep.subr.bf16.mxu0 %v1470_v36  ;;  %v755_v36 = vld [vmem:[%s1993_s4] sm:$0xff] }
  0xbc   :  { %v1527_v39 = vpack.c.bf16 %v756_v37, %v755_v36  ;;  %v952_v36 = vld [vmem:[%s1995_s6 + $0x30] sm:$0xff]  ;;  %v953_v37 = vld [vmem:[%s1995_s6 + $0x38] sm:$0xff] }
  0xbe   :  { %1473 = vmatpush1.bf16.msra.mxu0 %v1472_v41  ;;  %v757_v41 = vld [vmem:[%s1993_s4 + $0x10] sm:$0xff] }
  0xbf   :  { %1475 = vmatprep.subr.bf16.mxu0 %v1474_v42  ;;  %v758_v42 = vld [vmem:[%s1993_s4 + $0x18] sm:$0xff] }
  0xc0   :  { %v1530_v45 = vpack.c.bf16 %v758_v42, %v757_v41  ;;  %v956_v41 = vld [vmem:[%s1995_s6 + $0x50] sm:$0xff]  ;;  %v957_v42 = vld [vmem:[%s1995_s6 + $0x58] sm:$0xff] }
  0xc2   :  { %1477 = vmatpush1.bf16.msra.mxu0 %v1476_v48  ;;  %v1533_v48 = vpack.c.bf16 %v760_v43, %v759_v46  ;;  %v959_v46 = vld [vmem:[%s1995_s6 + $0x68] sm:$0xff] }
  0xc3   :  { %1479 = vmatprep.subr.bf16.mxu0 %v1478_v49  ;;  %v761_v49 = vld [vmem:[%s1993_s4 + $0x30] sm:$0xff] }
  0xc4   :  { %v1536_v51 = vpack.c.bf16 %v762_v50, %v761_v49  ;;  %v961_v49 = vld [vmem:[%s1995_s6 + $0x78] sm:$0xff] }
  0xc6   :  { %1481 = vmatpush1.bf16.msra.mxu0 %v1480_v55  ;;  %v1539_v55 = vpack.c.bf16 %v764_v54, %v763_v53 }
  0xc7   :  { %1483 = vmatprep.subr.bf16.mxu0 %v1482_v56  ;;  %v765_v56 = vld [vmem:[%s1993_s4 + $0x50] sm:$0xff] }
  0xc8   :  { %v1542_v58 = vpack.c.bf16 %v766_v57, %v765_v56  ;;  %v1044_v57 = vld [vmem:[%s1994_s5] ss:$0 sm:$0xff] }
  0xca   :  { %1485 = vmatpush1.bf16.msra.mxu0 %v1484_v60  ;;  %v1545_v60 = vpack.c.bf16 %v768_v59, %v767_v52  ;;  %v1045_v52 = vld [vmem:[%s1994_s5 + $0x1] ss:$0 sm:$0xff] }
  0xcb   :  { %1487 = vmatprep.subr.bf16.mxu0 %v1486_v61  ;;  %v769_v61 = vld [vmem:[%s1993_s4 + $0x70] sm:$0xff] }
  0xcc   :  { %v1548_v18 = vpack.c.bf16 %v770_v62, %v769_v61 }
  0xce   :  { %1489 = vmatpush1.bf16.msra.mxu0 %v1488_v1 }
  0xcf   :  { %1491 = vmatprep.subr.bf16.mxu0 %v1490_v2 }
  0xd2   :  { %1493 = vmatpush1.bf16.msra.mxu0 %v1492_v4 }
  0xd5   :  { %632 = vmatmul.mubr.f32.vlgmr.msra.gmra.mrb[0].mxu0 %v1809_v34  ;;  %v1520_v34 = vpack.c.bf16 %v657_v13, %v656_v12 }
  0xd7   :  { %1521 = vmatpush3.bf16.msra.mxu1 %v1520_v34 }
  0xd8   :  { %1523 = vmatprep.subr.bf16.mxu1 %v1522_v17 }
  0xdb   :  { %1525 = vmatpush3.bf16.msra.mxu1 %v1524_v21 }
  0xdc   :  { %1526 = vmatprep.subr.bf16.mxu1 %v1649_v22 }
 0x142   :  { %v420_v23 = vpop.f32.mrb[0].mxu1 }
 0x143   :  { %v422_v24 = vpop.f32.mrb[1].mxu1  ;;  %v421_v29 = vadd.f32 %v420_v23, %v303_v27 }
 0x144   :  { %v423_v10 = vadd.f32 %v422_v24, %v307_v28  ;;  %v946_v24 = vld [vmem:[%s1995_s6] sm:$0xff] }
 0x145   :  { %v1575_v27 = vpack.c.bf16 %v947_v26, %v946_v24 }
 0x1a8   :  { %v633_v30 = vpop.f32.mrb[0].mxu0 }
 0x1a9   :  { %v1599_v31 = vadd.f32 %v633_v30, %v421_v29  ;;  %v635_v32 = vpop.f32.mrb[1].mxu0  ;;  %v948_v29 = vld [vmem:[%s1995_s6 + $0x10] sm:$0xff] }
 0x1aa   :  { %v1601_v33 = vadd.f32 %v635_v32, %v423_v10  ;;  %v949_v10 = vld [vmem:[%s1995_s6 + $0x18] sm:$0xff]  ;;  %v951_v32 = vld [vmem:[%s1995_s6 + $0x28] sm:$0xff] }
 0x1ab   :  { %v640_v38 = vmul.f32 0.2, %v1599_v31  ;;  %vm638_vm0 = vcmp.gt.f32.partialorder %v1599_v31, 0.0  ;;  %v1578_v30 = vpack.c.bf16 %v949_v10, %v948_v29 }
 0x1ac   :  { %v641_v35 = vmul.f32 0.2, %v1601_v33  ;;  %vm639_vm1 = vcmp.gt.f32.partialorder %v1601_v33, 0.0 }
 0x1ad   :  { %v642_v44 = vsel %vm638_vm0, %v1599_v31, %v640_v38  ;;  %v950_v31 = vld [vmem:[%s1995_s6 + $0x20] sm:$0xff]  ;;  %v1584_v38 = vpack.c.bf16 %v953_v37, %v952_v36 }
 0x1ae   :  { %v643_v40 = vsel %vm639_vm1, %v1601_v33, %v641_v35  ;;  %v1581_v33 = vpack.c.bf16 %v951_v32, %v950_v31  ;;  %v954_v35 = vld [vmem:[%s1995_s6 + $0x40] sm:$0xff] }
 0x1af   :  { %740 = vmatprep.mubr.f32.mxu1 %v643_v40 }
 0x1b0   :  { %741 = vmatmul.mubr.f32.vlgmr.msra.gmra.mrb[2].mxu1 %v642_v44  ;;  %v1590_v44 = vpack.c.bf16 %v957_v42, %v956_v41 }
 0x1b1   :  { %1528 = vmatpush3.bf16.msra.mxu1 %v1527_v39  ;;  %1165 = vmatprep.mubr.msk.f32.mxu1 %vm1650_vm2, %v1651_v63 }
 0x1b2   :  { %1529 = vmatprep.subr.bf16.mxu1 %v1649_v22 }
 0x1b5   :  { %1531 = vmatpush3.bf16.msra.mxu1 %v1530_v45 }
 0x1b6   :  { %1532 = vmatprep.subr.bf16.mxu1 %v1649_v22 }
 0x1b9   :  { %1534 = vmatpush3.bf16.msra.mxu1 %v1533_v48 }
 0x1ba   :  { %1535 = vmatprep.subr.bf16.mxu1 %v1649_v22 }
 0x1bd   :  { %1537 = vmatpush3.bf16.msra.mxu1 %v1536_v51 }
 0x1be   :  { %1538 = vmatprep.subr.bf16.mxu1 %v1649_v22 }
 0x1c1   :  { %1540 = vmatpush3.bf16.msra.mxu1 %v1539_v55 }
 0x1c2   :  { %1541 = vmatprep.subr.bf16.mxu1 %v1649_v22 }
 0x1c5   :  { %1543 = vmatpush3.bf16.msra.mxu1 %v1542_v58 }
 0x1c6   :  { %1544 = vmatprep.subr.bf16.mxu1 %v1649_v22 }
 0x1c9   :  { %1546 = vmatpush3.bf16.msra.mxu1 %v1545_v60 }
 0x1ca   :  { %1547 = vmatprep.subr.bf16.mxu1 %v1649_v22 }
 0x1cd   :  { %1549 = vmatpush3.bf16.msra.mxu1 %v1548_v18 }
 0x1ce   :  { %1550 = vmatprep.subr.bf16.mxu1 %v1649_v22 }
 0x283   :  { %v1079_v0 = vpop.f32.mrb[2].mxu1 }
 0x284   :  { %v1080_v1 = vpop.f32.mrb[3].mxu1 }
 0x285   :  { %v1081_v2 = vadd.f32 %v1080_v1, %v1079_v0 }
 0x287   :  { %v747_v16 = vsel %vm746_vm3, %v1081_v2, 0.0 }
 0x288   :  { %v748_v3 = vrot.slane %v747_v16, 4 }
 0x28a   :  { %v749_v4 = vadd.f32 %v748_v3, %v747_v16 }
 0x28c   :  { %v750_v5 = vrot.slane %v749_v4, 2 }
 0x28e   :  { %v751_v6 = vadd.f32 %v750_v5, %v749_v4 }
 0x290   :  { %v752_v7 = vrot.slane %v751_v6, 1 }
 0x292   :  { %v753_v8 = vadd.f32 %v752_v7, %v751_v6 }
 0x294   :  { %v754_v9 = vmul.f32 0.5, %v753_v8 }
 0x296   :  { %1166 = vmatmul.mubr.f32.vlgmr.msra.gmra.mrb[4].mxu1 %v754_v9 }
 0x297   :  { %1552 = vmatpush3.bf16.msra.mxu1 %v1527_v39  ;;  %1200 = vmatprep.mubr.msk.f32.mxu1 %vm1650_vm2, %v1651_v63  ;;  %v955_v39 = vld [vmem:[%s1995_s6 + $0x48] sm:$0xff] }
 0x298   :  { %1553 = vmatprep.subr.bf16.mxu1 %v1649_v22  ;;  %v1587_v40 = vpack.c.bf16 %v955_v39, %v954_v35 }
 0x29b   :  { %1555 = vmatpush3.bf16.msra.mxu1 %v1530_v45  ;;  %v958_v45 = vld [vmem:[%s1995_s6 + $0x60] sm:$0xff] }
 0x29c   :  { %1556 = vmatprep.subr.bf16.mxu1 %v1649_v22  ;;  %v1593_v43 = vpack.c.bf16 %v959_v46, %v958_v45 }
 0x29f   :  { %1558 = vmatpush3.bf16.msra.mxu1 %v1533_v48  ;;  %v960_v48 = vld [vmem:[%s1995_s6 + $0x70] sm:$0xff] }
 0x2a0   :  { %1559 = vmatprep.subr.bf16.mxu1 %v1649_v22  ;;  %v1596_v50 = vpack.c.bf16 %v961_v49, %v960_v48 }
 0x2a3   :  { %1561 = vmatpush3.bf16.msra.mxu1 %v1536_v51 }
 0x2a4   :  { %1562 = vmatprep.subr.bf16.mxu1 %v1649_v22 }
 0x2a7   :  { %1564 = vmatpush3.bf16.msra.mxu1 %v1539_v55 }
 0x2a8   :  { %1565 = vmatprep.subr.bf16.mxu1 %v1649_v22 }
 0x2ab   :  { %1567 = vmatpush3.bf16.msra.mxu1 %v1542_v58 }
 0x2ac   :  { %1568 = vmatprep.subr.bf16.mxu1 %v1649_v22 }
 0x2af   :  { %1570 = vmatpush3.bf16.msra.mxu1 %v1545_v60 }
 0x2b0   :  { %1571 = vmatprep.subr.bf16.mxu1 %v1649_v22 }
 0x2b3   :  { %1573 = vmatpush3.bf16.msra.mxu1 %v1548_v18 }
 0x2b4   :  { %1574 = vmatprep.subr.bf16.mxu1 %v1649_v22 }
 0x369   :  { %v837_v11 = vpop.f32.mrb[4].mxu1 }
 0x36a   :  { %v844_v12 = vrot.slane %v837_v11, %v1847_v25  ;;  %v1167_v13 = vpop.f32.mrb[5].mxu1 }
 0x36c   :  { %v845_v34 = vsub.f32 %v1081_v2, %v844_v12 }
 0x36e   :  { %v846_v14 = vmul.f32 %v845_v34, %v845_v34 }
 0x370   :  { %v847_v15 = vsel %vm746_vm3, %v846_v14, 0.0 }
 0x371   :  { %v848_v17 = vrot.slane %v847_v15, 4 }
 0x373   :  { %v849_v19 = vadd.f32 %v848_v17, %v847_v15 }
 0x375   :  { %v850_v20 = vrot.slane %v849_v19, 2 }
 0x377   :  { %v851_v21 = vadd.f32 %v850_v20, %v849_v19 }
 0x379   :  { %v852_v23 = vrot.slane %v851_v21, 1 }
 0x37b   :  { %v853_v47 = vadd.f32 %v852_v23, %v851_v21 }
 0x37d   :  { %v854_v28 = vmul.f32 0.5, %v853_v47 }
 0x37f   :  { %1201 = vmatmul.mubr.f32.vlgmr.msra.gmra.mrb[6].mxu1 %v854_v28 }
 0x380   :  { %1576 = vmatpush3.bf16.msra.mxu1 %v1575_v27  ;;  %1235 = vmatprep.mubr.msk.f32.mxu1 %vm1650_vm2, %v1651_v63 }
 0x381   :  { %1577 = vmatprep.subr.bf16.mxu1 %v1649_v22 }
 0x384   :  { %1579 = vmatpush3.bf16.msra.mxu1 %v1578_v30 }
 0x385   :  { %1580 = vmatprep.subr.bf16.mxu1 %v1649_v22 }
 0x388   :  { %1582 = vmatpush3.bf16.msra.mxu1 %v1581_v33 }
 0x389   :  { %1583 = vmatprep.subr.bf16.mxu1 %v1649_v22 }
 0x38c   :  { %1585 = vmatpush3.bf16.msra.mxu1 %v1584_v38 }
 0x38d   :  { %1586 = vmatprep.subr.bf16.mxu1 %v1649_v22 }
 0x390   :  { %1588 = vmatpush3.bf16.msra.mxu1 %v1587_v40 }
 0x391   :  { %1589 = vmatprep.subr.bf16.mxu1 %v1649_v22 }
 0x394   :  { %1591 = vmatpush3.bf16.msra.mxu1 %v1590_v44 }
 0x395   :  { %1592 = vmatprep.subr.bf16.mxu1 %v1649_v22 }
 0x398   :  { %1594 = vmatpush3.bf16.msra.mxu1 %v1593_v43 }
 0x399   :  { %1595 = vmatprep.subr.bf16.mxu1 %v1649_v22 }
 0x39c   :  { %1597 = vmatpush3.bf16.msra.mxu1 %v1596_v50 }
 0x452   :  { %v923_v51 = vpop.f32.mrb[6].mxu1 }
 0x453   :  { %v924_v53 = vadd.f32 1e-05, %v923_v51  ;;  %v1202_v54 = vpop.f32.mrb[7].mxu1 }
 0x455   :  { %1615 = vrsqrt.f32 %v924_v53 }
 0x45f   :  { %v1616_v55 = vpop.eup %1615 }
 0x460   :  { %v931_v56 = vrot.slane %v1616_v55, %v1847_v25 }
 0x462   :  { %v932_v58 = vmul.f32 %v931_v56, %v845_v34 }
 0x464   :  { %v937_v59 = vmul.f32 %v1044_v57, %v932_v58 }
 0x466   :  { %v942_v60 = vadd.f32 %v1045_v52, %v937_v59 }
 0x468   :  { %vm943_vm4 = vcmp.gt.f32.partialorder %v942_v60, 0.0  ;;  %v944_v22 = vmul.f32 0.2, %v942_v60 }
 0x46a   :  { %v945_v61 = vsel %vm943_vm4, %v942_v60, %v944_v22 }
 0x46b   :  { %1236 = vmatmul.mubr.f32.vlgmr.msra.gmra.mrb[8].mxu1 %v945_v61 }
 0x53e   :  { %v1028_v62 = vpop.f32.mrb[8].mxu1 }
 0x53f   :  { %v1046_v18 = vmul.f32 -1.442695, %v1028_v62  ;;  %v1237_v63 = vpop.f32.mrb[9].mxu1 }
 0x541   :  { %1617 = vpow2.f32 %v1046_v18 }
 0x54b   :  { %v1618_v25 = vpop.eup %1617 }
 0x54c   :  { %v1035_v0 = vadd.f32 1.0, %v1618_v25 }
 0x54e   :  { %1619 = vrcp.f32 %v1035_v0 }
 0x558   :  { %v1620_v1 = vpop.eup %1619 }
 0x559   :  { %1038 = vst [vmem:[%s1996_s7] sm:$0x3] %v1620_v1 }
 0x55a   :  { %1043 = vsyncpa [#allocation3], 1 }

</bundles_post_ra>
